<compile_context>
chip_gen: v5e
topology: v5e:2x2
jax: 0.10.0
libtpu: 0.0.40
codegen_flags: <defaults>
</compile_context>

<pallas_src>
import math

import jax
import jax.numpy as jnp
from jax import lax
from jax.experimental import pallas as pl
from jax.experimental.pallas import tpu as pltpu

CONFIG = dict(
    num_head=4,
    num_scalar_qk=4,
    num_point_qk=2,
    num_scalar_v=4,
    num_point_v=2,
    num_channel=32,          # == msa_channel so FoldBlock/IPA dims are consistent
    num_layer=2,
    num_layer_in_transition=2,
    pair_channels=[4, 8],
    position_scale=10.0,
    dropout=0.1,
    pair_dropout=0.1,
    gen_seq=False,
)
MSA_CHANNEL = 32
PAIR_CHANNEL = CONFIG["pair_channels"][-1]

VMEM_LIMIT = 32 * 1024 * 1024   # explicit scoped-VMEM budget (safe on v5e/v6e/v7x)
_LN_EPS = 1e-5


# ----------------------------------------------------------------------------
# Pallas kernel 1: generic Linear (matmul + bias, optional fused ReLU), row-tiled.
# ----------------------------------------------------------------------------
def _linear_kernel(x_ref, w_ref, b_ref, o_ref):
    o_ref[...] = (
        jnp.dot(x_ref[...], w_ref[...], preferred_element_type=jnp.float32)
        + b_ref[...]
    )


def _linear_relu_kernel(x_ref, w_ref, b_ref, o_ref):
    o_ref[...] = jnp.maximum(
        jnp.dot(x_ref[...], w_ref[...], preferred_element_type=jnp.float32)
        + b_ref[...], 0.0)


def linear_pallas(x, w, b, *, tm=512, compute_dtype=jnp.float32, relu=False):
    """x: (..., K) @ w: (K, Nout) + b: (Nout,) -> (..., Nout).  Tiled over rows."""
    shp = x.shape
    K = shp[-1]
    x2 = x.reshape(-1, K).astype(compute_dtype)
    M = x2.shape[0]
    Nout = w.shape[-1]
    TM = M if M <= tm else tm
    kernel = _linear_relu_kernel if relu else _linear_kernel
    out = pl.pallas_call(
        kernel,
        grid=(pl.cdiv(M, TM),),
        in_specs=[
            pl.BlockSpec((TM, K), lambda i: (i, 0)),
            pl.BlockSpec((K, Nout), lambda i: (0, 0)),
            pl.BlockSpec((1, Nout), lambda i: (0, 0)),
        ],
        out_specs=pl.BlockSpec((TM, Nout), lambda i: (i, 0)),
        out_shape=jax.ShapeDtypeStruct((M, Nout), jnp.float32),
        compiler_params=pltpu.CompilerParams(
            dimension_semantics=("parallel",), vmem_limit_bytes=VMEM_LIMIT),
    )(x2, w.astype(compute_dtype), b.reshape(1, Nout).astype(jnp.float32))
    return out.reshape(shp[:-1] + (Nout,))


# ----------------------------------------------------------------------------
# Pallas kernel 2: fused LayerNorm -> Linear (single_layer_norm + initial_projection).
# ----------------------------------------------------------------------------
def _ln_linear_kernel(x_ref, g_ref, b_ref, w_ref, bb_ref, o_ref):
    x = x_ref[...]
    mu = jnp.mean(x, axis=-1, keepdims=True)
    var = jnp.mean((x - mu) ** 2, axis=-1, keepdims=True)
    a = (x - mu) * lax.rsqrt(var + _LN_EPS) * g_ref[...] + b_ref[...]
    o_ref[...] = (
        jnp.dot(a, w_ref[...], preferred_element_type=jnp.float32) + bb_ref[...])


def ln_linear_pallas(x, g, b, w, bb, *, tm=512):
    shp = x.shape
    C = shp[-1]
    Nout = w.shape[-1]
    x2 = x.reshape(-1, C).astype(jnp.float32)
    M = x2.shape[0]
    TM = M if M <= tm else tm
    r = lambda v: v.reshape(1, -1).astype(jnp.float32)
    out = pl.pallas_call(
        _ln_linear_kernel,
        grid=(pl.cdiv(M, TM),),
        in_specs=[
            pl.BlockSpec((TM, C), lambda i: (i, 0)),
            pl.BlockSpec((1, C), lambda i: (0, 0)),
            pl.BlockSpec((1, C), lambda i: (0, 0)),
            pl.BlockSpec((C, Nout), lambda i: (0, 0)),
            pl.BlockSpec((1, Nout), lambda i: (0, 0)),
        ],
        out_specs=pl.BlockSpec((TM, Nout), lambda i: (i, 0)),
        out_shape=jax.ShapeDtypeStruct((M, Nout), jnp.float32),
        compiler_params=pltpu.CompilerParams(
            dimension_semantics=("parallel",), vmem_limit_bytes=VMEM_LIMIT),
    )(x2, r(g), r(b), w.astype(jnp.float32), r(bb))
    return out.reshape(shp[:-1] + (Nout,))


# ----------------------------------------------------------------------------
# Pallas kernel 3: fused post-attention block.
#   x = act + act_attn
#   a1 = LN1(x) ; t = relu(a1 @ w1 + b1) @ w2 + b2 ; a2 = LN2(t + a1)
#   outputs: a2 (new act), a2 @ w_affine + b_affine (affine update)
# ----------------------------------------------------------------------------
def _post_attn_kernel(act_ref, attn_ref, g1_ref, bg1_ref,
                      w1_ref, b1_ref, w2_ref, b2_ref,
                      g2_ref, bg2_ref, wa_ref, ba_ref,
                      act_o_ref, aff_o_ref):
    x = act_ref[...] + attn_ref[...]
    mu = jnp.mean(x, axis=-1, keepdims=True)
    var = jnp.mean((x - mu) ** 2, axis=-1, keepdims=True)
    a1 = (x - mu) * lax.rsqrt(var + _LN_EPS) * g1_ref[...] + bg1_ref[...]

    h = jnp.maximum(
        jnp.dot(a1, w1_ref[...], preferred_element_type=jnp.float32) + b1_ref[...], 0.0)
    t = jnp.dot(h, w2_ref[...], preferred_element_type=jnp.float32) + b2_ref[...]

    x2 = t + a1
    mu2 = jnp.mean(x2, axis=-1, keepdims=True)
    var2 = jnp.mean((x2 - mu2) ** 2, axis=-1, keepdims=True)
    a2 = (x2 - mu2) * lax.rsqrt(var2 + _LN_EPS) * g2_ref[...] + bg2_ref[...]

    act_o_ref[...] = a2
    aff_o_ref[...] = (
        jnp.dot(a2, wa_ref[...], preferred_element_type=jnp.float32) + ba_ref[...])


def post_attention_pallas(act, act_attn, blk, *, tm=512):
    B, N, C = act.shape
    M = B * N
    w1, b1 = blk["transition"][0]["w"], blk["transition"][0]["b"]
    w2, b2 = blk["transition"][1]["w"], blk["transition"][1]["b"]
    wa, ba = blk["affine_update"]["w"], blk["affine_update"]["b"]
    C1, C2, A = w1.shape[-1], w2.shape[-1], wa.shape[-1]
    assert C2 == C, "transition residual requires num_channel == msa_channel"
    TM = M if M <= tm else tm
    r = lambda v: v.reshape(1, -1).astype(jnp.float32)
    f32 = lambda v: v.astype(jnp.float32)

    act_out, aff = pl.pallas_call(
        _post_attn_kernel,
        grid=(pl.cdiv(M, TM),),
        in_specs=[
            pl.BlockSpec((TM, C), lambda i: (i, 0)),
            pl.BlockSpec((TM, C), lambda i: (i, 0)),
            pl.BlockSpec((1, C), lambda i: (0, 0)),
            pl.BlockSpec((1, C), lambda i: (0, 0)),
            pl.BlockSpec((C, C1), lambda i: (0, 0)),
            pl.BlockSpec((1, C1), lambda i: (0, 0)),
            pl.BlockSpec((C1, C2), lambda i: (0, 0)),
            pl.BlockSpec((1, C2), lambda i: (0, 0)),
            pl.BlockSpec((1, C2), lambda i: (0, 0)),
            pl.BlockSpec((1, C2), lambda i: (0, 0)),
            pl.BlockSpec((C2, A), lambda i: (0, 0)),
            pl.BlockSpec((1, A), lambda i: (0, 0)),
        ],
        out_specs=[
            pl.BlockSpec((TM, C2), lambda i: (i, 0)),
            pl.BlockSpec((TM, A), lambda i: (i, 0)),
        ],
        out_shape=(jax.ShapeDtypeStruct((M, C2), jnp.float32),
                   jax.ShapeDtypeStruct((M, A), jnp.float32)),
        compiler_params=pltpu.CompilerParams(
            dimension_semantics=("parallel",), vmem_limit_bytes=VMEM_LIMIT),
    )(act.reshape(M, C).astype(jnp.float32),
      act_attn.reshape(M, C).astype(jnp.float32),
      r(blk["attention_layer_norm"]["g"]), r(blk["attention_layer_norm"]["b"]),
      f32(w1), r(b1), f32(w2), r(b2),
      r(blk["transition_layer_norm"]["g"]), r(blk["transition_layer_norm"]["b"]),
      f32(wa), r(ba))
    return act_out.reshape(B, N, C2), aff.reshape(B, N, A)


# ----------------------------------------------------------------------------
# Channel-last (NHWC) conv via im2col + row-tiled Pallas matmul (no transposes),
# plus fused "ResNet tail": conv2 + 1x1 skip conv + add + ReLU in one kernel.
# ----------------------------------------------------------------------------
def _im2col(x, kh, kw):
    B, H, W, Cin = x.shape
    ph, pw = kh // 2, kw // 2
    xp = jnp.pad(x, ((0, 0), (ph, ph), (pw, pw), (0, 0)))
    # TODO(synk): im2col still materializes a kh*kw-fold copy in HBM; a halo-tiled shifted-matmul
    # conv kernel would remove it, but channel-last already removes all NCHW<->NHWC transposes.
    cols = [xp[:, dy:dy + H, dx:dx + W, :] for dy in range(kh) for dx in range(kw)]
    return jnp.concatenate(cols, axis=-1)                     # (B, H, W, kh*kw*Cin)


def conv2d_nhwc_pallas(x, w, b, *, relu=False):
    """x: (B, H, W, Cin) NHWC; w: (Cout, Cin, kh, kw) torch layout; b: (Cout,)."""
    B, H, W, Cin = x.shape
    Cout, _, kh, kw = w.shape
    if kh == 1 and kw == 1:
        w2 = w.reshape(Cout, Cin).T
        return linear_pallas(x, w2, b, compute_dtype=jnp.bfloat16, relu=relu)
    col = _im2col(x, kh, kw)
    w2 = jnp.transpose(w, (2, 3, 1, 0)).reshape(kh * kw * Cin, Cout)
    return linear_pallas(col, w2, b, compute_dtype=jnp.bfloat16, relu=relu)


def _conv_tail_kernel(c_ref, s_ref, w2_ref, b2_ref, ws_ref, bs_ref, o_ref):
    h = jnp.dot(c_ref[...], w2_ref[...], preferred_element_type=jnp.float32) + b2_ref[...]
    h = h + jnp.dot(s_ref[...], ws_ref[...], preferred_element_type=jnp.float32) + bs_ref[...]
    o_ref[...] = jnp.maximum(h, 0.0)


def conv_tail_pallas(col2, skip, w2, b2, ws, bs, *, tm=512):
    """relu(col2 @ w2 + b2 + skip @ ws + bs), row-tiled (fused conv2 + skip conv + add + relu)."""
    shp = skip.shape[:-1]
    K2, Ks, Cout = col2.shape[-1], skip.shape[-1], w2.shape[-1]
    c2 = col2.reshape(-1, K2).astype(jnp.bfloat16)
    s2 = skip.reshape(-1, Ks).astype(jnp.bfloat16)
    M = c2.shape[0]
    TM = M if M <= tm else tm
    out = pl.pallas_call(
        _conv_tail_kernel,
        grid=(pl.cdiv(M, TM),),
        in_specs=[
            pl.BlockSpec((TM, K2), lambda i: (i, 0)),
            pl.BlockSpec((TM, Ks), lambda i: (i, 0)),
            pl.BlockSpec((K2, Cout), lambda i: (0, 0)),
            pl.BlockSpec((1, Cout), lambda i: (0, 0)),
            pl.BlockSpec((Ks, Cout), lambda i: (0, 0)),
            pl.BlockSpec((1, Cout), lambda i: (0, 0)),
        ],
        out_specs=pl.BlockSpec((TM, Cout), lambda i: (i, 0)),
        out_shape=jax.ShapeDtypeStruct((M, Cout), jnp.float32),
        compiler_params=pltpu.CompilerParams(
            dimension_semantics=("parallel",), vmem_limit_bytes=VMEM_LIMIT),
    )(c2, s2, w2.astype(jnp.bfloat16), b2.reshape(1, Cout).astype(jnp.float32),
      ws.astype(jnp.bfloat16), bs.reshape(1, Cout).astype(jnp.float32))
    return out.reshape(shp + (Cout,))


def resnet_block_noT(p, x):
    # TODO(synk): conv_block.Resnet_block_noT source not provided; standard 2-conv residual block.
    Cout, Cmid, kh, kw = p["conv2_w"].shape
    Cin = x.shape[-1]
    h = conv2d_nhwc_pallas(x, p["conv1_w"], p["conv1_b"], relu=True)   # conv1 + relu fused
    col2 = _im2col(h, kh, kw)
    w2 = jnp.transpose(p["conv2_w"], (2, 3, 1, 0)).reshape(kh * kw * Cmid, Cout)
    if Cin != Cout:
        ws = p["skip_w"].reshape(Cout, Cin).T
        bs = p["skip_b"]
    else:
        ws = jnp.eye(Cin, dtype=jnp.float32)
        bs = jnp.zeros((Cin,), jnp.float32)
    return conv_tail_pallas(col2, x, w2, p["conv2_b"], ws, bs)


# ----------------------------------------------------------------------------
# Pallas kernel 4: Invariant Point Attention core, per (batch, query-tile, head).
# ----------------------------------------------------------------------------
def _ipa_attention_kernel(qa_ref, ka_ref, vs_ref, vp_ref, w2d_ref, in2d_ref, o_ref):
    qa = qa_ref[0, 0]                        # (TQ, Daug)  f32  (augmented query rows)
    ka = ka_ref[0, 0]                        # (N,  Daug)  f32  (augmented key rows)
    in2d = in2d_ref[0]                       # (TQ, N, Cp) f32

    # Scalar-QK + point-distance + per-head attention_2d-bias constant: ONE MXU matmul.
    logits = lax.dot_general(qa, ka, (((1,), (1,)), ((), ())),
                             preferred_element_type=jnp.float32)       # (TQ, N)

    # Fused data-dependent 2d bias: sum_c in2d[i,j,c] * (aw * w2d[c, h])  (scale pre-folded).
    logits = logits + jnp.sum(in2d * w2d_ref[0], axis=-1)              # (TQ, N)

    # TODO(synk): reference FoldBlock never passes a mask to IPA; all-ones mask assumed, so
    # the -FP16_huge*(1-mask) penalty is a no-op and is omitted.

    m = jnp.max(logits, axis=-1, keepdims=True)
    e = jnp.exp(logits - m)                                            # (TQ, N) f32
    inv = 1.0 / jnp.sum(e, axis=-1, keepdims=True)                     # normalize AFTER matmuls

    p16 = e.astype(jnp.bfloat16)             # bf16 MXU operands, f32 accumulation
    os_ = jnp.dot(p16, vs_ref[0, 0].astype(jnp.bfloat16),
                  preferred_element_type=jnp.float32)                  # (TQ, Csv)
    op_ = jnp.dot(p16, vp_ref[0, 0].astype(jnp.bfloat16),
                  preferred_element_type=jnp.float32)                  # (TQ, 3*Pv)
    o2d = jnp.sum(e[:, :, None] * in2d, axis=1)                        # (TQ, Cp)

    o_ref[0, 0] = (jnp.concatenate([os_, op_, o2d], axis=-1) * inv).astype(o_ref.dtype)


def ipa_attention_pallas(q_aug, k_aug, vs, vp, w2d_scaled, inputs_2d):
    B, H, N, Daug = q_aug.shape
    Csv = vs.shape[-1]
    P3v = vp.shape[-1]
    Cp = inputs_2d.shape[-1]
    Ctot = Csv + P3v + Cp

    TQ = N if N <= 256 else 128              # query tiling bounds VMEM to O(TQ*N)
    QT = pl.cdiv(N, TQ)

    w2d3 = jnp.asarray(w2d_scaled, jnp.float32).T.reshape(H, 1, Cp)
    f32 = lambda a: a.astype(jnp.float32)

    out = pl.pallas_call(
        _ipa_attention_kernel,
        grid=(B, QT, H),                     # heads innermost -> inputs_2d tile reused across heads
        in_specs=[
            pl.BlockSpec((1, 1, TQ, Daug), lambda b, qi, h: (b, h, qi, 0)),
            pl.BlockSpec((1, 1, N, Daug), lambda b, qi, h: (b, h, 0, 0)),
            pl.BlockSpec((1, 1, N, Csv), lambda b, qi, h: (b, h, 0, 0)),
            pl.BlockSpec((1, 1, N, P3v), lambda b, qi, h: (b, h, 0, 0)),
            pl.BlockSpec((1, 1, Cp), lambda b, qi, h: (h, 0, 0)),
            pl.BlockSpec((1, TQ, N, Cp), lambda b, qi, h: (b, qi, 0, 0)),
        ],
        out_specs=pl.BlockSpec((1, 1, TQ, Ctot), lambda b, qi, h: (b, h, qi, 0)),
        out_shape=jax.ShapeDtypeStruct((B, H, N, Ctot), jnp.float32),
        compiler_params=pltpu.CompilerParams(
            dimension_semantics=("parallel", "parallel", "arbitrary"),
            vmem_limit_bytes=VMEM_LIMIT),
    )(f32(q_aug), f32(k_aug), f32(vs), f32(vp), w2d3, f32(inputs_2d))
    return out


# ----------------------------------------------------------------------------
# QuatAffine (AF2 quat_affine semantics)
# ----------------------------------------------------------------------------
def quat_to_rot(q):
    a, b, c, d = q[..., 0], q[..., 1], q[..., 2], q[..., 3]
    return [
        [a * a + b * b - c * c - d * d, 2 * (b * c - a * d), 2 * (b * d + a * c)],
        [2 * (b * c + a * d), a * a - b * b + c * c - d * d, 2 * (c * d - a * b)],
        [2 * (b * d - a * c), 2 * (c * d + a * b), a * a - b * b - c * c + d * d],
    ]


def quat_multiply_by_vec(q, v):
    a, b, c, d = q[..., 0], q[..., 1], q[..., 2], q[..., 3]
    vx, vy, vz = v[..., 0], v[..., 1], v[..., 2]
    return jnp.stack([
        -b * vx - c * vy - d * vz,
        a * vx + c * vz - d * vy,
        a * vy - b * vz + d * vx,
        a * vz + b * vy - c * vx,
    ], axis=-1)


class QuatAffine:
    def __init__(self, quaternion, translation, normalize=True):
        if normalize:
            quaternion = quaternion / jnp.linalg.norm(quaternion, axis=-1, keepdims=True)
        self.quaternion = quaternion
        self.translation = list(translation)
        self.rotation = quat_to_rot(quaternion)

    @classmethod
    def from_tensor(cls, t, normalize=False):
        return cls(t[..., :4], [t[..., 4], t[..., 5], t[..., 6]], normalize=normalize)

    def to_tensor(self):
        return jnp.concatenate(
            [self.quaternion] + [x[..., None] for x in self.translation], axis=-1)

    def _expanded(self, extra_dims):
        def exp(x):
            for _ in range(extra_dims):
                x = x[..., None]
            return x
        rr = [[exp(self.rotation[i][j]) for j in range(3)] for i in range(3)]
        tt = [exp(self.translation[i]) for i in range(3)]
        return rr, tt

    def apply_to_point(self, point, extra_dims=0):
        rr, tt = self._expanded(extra_dims)
        return [rr[i][0] * point[0] + rr[i][1] * point[1] + rr[i][2] * point[2] + tt[i]
                for i in range(3)]

    def invert_point(self, point, extra_dims=0):
        rr, tt = self._expanded(extra_dims)
        p = [point[i] - tt[i] for i in range(3)]
        return [rr[0][i] * p[0] + rr[1][i] * p[1] + rr[2][i] * p[2] for i in range(3)]

    def pre_compose(self, update):
        vec = update[..., :3]
        trans_update = [update[..., 3], update[..., 4], update[..., 5]]
        new_q = self.quaternion + quat_multiply_by_vec(self.quaternion, vec)
        rotated = [self.rotation[i][0] * trans_update[0]
                   + self.rotation[i][1] * trans_update[1]
                   + self.rotation[i][2] * trans_update[2] for i in range(3)]
        new_t = [self.translation[i] + rotated[i] for i in range(3)]
        return QuatAffine(new_q, new_t, normalize=True)


def generate_quataffine(quataffine):
    quaternion = quataffine[:, :, :4]
    translation = quataffine[:, :, 4:]
    return QuatAffine(quaternion,
                      [translation[..., 0], translation[..., 1], translation[..., 2]],
                      normalize=True)


# ----------------------------------------------------------------------------
# Pair-feature generation (channel-last).  rigid.quat_affine_to_pos / get_map_ch not in source.
# ----------------------------------------------------------------------------
def quat_affine_to_pos(quaternion, translation):
    # TODO(synk): rigid.quat_affine_to_pos not provided; reconstruct ideal N/CA/C backbone atoms.
    if isinstance(translation, (list, tuple)):
        translation = jnp.stack(translation, axis=-1)
    q = quaternion / (jnp.linalg.norm(quaternion, axis=-1, keepdims=True) + 1e-12)
    rot = quat_to_rot(q)
    R = jnp.stack([jnp.stack(r, axis=-1) for r in rot], axis=-2)   # (..., 3, 3)
    local = jnp.array([[-0.5272, 1.3593, 0.0],     # N
                       [0.0, 0.0, 0.0],            # CA
                       [1.5233, 0.0, 0.0]],        # C
                      dtype=jnp.float32)
    pos = jnp.einsum("...ij,aj->...ai", R, local) + translation[..., None, :]
    return pos                                                     # (..., 3 atoms, 3)


def _dihedral(p0, p1, p2, p3, eps=1e-8):
    b0 = p1 - p0
    b1 = p2 - p1
    b2 = p3 - p2
    n1 = jnp.cross(b0, b1)
    n2 = jnp.cross(b1, b2)
    b1n = b1 / (jnp.linalg.norm(b1, axis=-1, keepdims=True) + eps)
    m1 = jnp.cross(n1, b1n)
    x = jnp.sum(n1 * n2, axis=-1)
    y = jnp.sum(m1 * n2, axis=-1)
    return jnp.arctan2(y, x)


def _planar_angle(a, b, c, eps=1e-8):
    v1 = a - b
    v2 = c - b
    cos = jnp.sum(v1 * v2, axis=-1) / (
        jnp.linalg.norm(v1, axis=-1) * jnp.linalg.norm(v2, axis=-1) + eps)
    return jnp.arccos(jnp.clip(cos, -1.0, 1.0))


def get_map_ch(pos):
    # TODO(synk): get_map_ch not provided; trRosetta-style pairwise (dist, omega, theta, phi).
    n, ca, c = pos[..., 0, :], pos[..., 1, :], pos[..., 2, :]
    bvec = ca - n
    cvec = c - ca
    avec = jnp.cross(bvec, cvec)
    cb = -0.58273431 * avec + 0.56802827 * bvec - 0.54067466 * cvec + ca

    cb_i, cb_j = cb[:, :, None, :], cb[:, None, :, :]
    ca_i, ca_j = ca[:, :, None, :], ca[:, None, :, :]
    n_i = n[:, :, None, :]

    d = jnp.sqrt(jnp.sum((cb_i - cb_j) ** 2, axis=-1) + 1e-12)
    omega = _dihedral(ca_i, cb_i, cb_j, ca_j)
    theta = _dihedral(n_i, ca_i, cb_i, cb_j)
    phi = _planar_angle(ca_i, cb_i, cb_j)
    return jnp.stack([d, omega, theta, phi], axis=-1)              # (B, N, N, 4) channel-last


def process_pair(pair_feature, mask_dist=20.0):
    # TODO(synk): reference process_pair has inconsistent indexing; implementing its intent.
    d = pair_feature[..., 0]
    far = d >= mask_dist
    ch0 = jnp.minimum(d, mask_dist) / 10.0 - 1.0
    ch1 = jnp.where(far, 1.0, pair_feature[..., 1] / math.pi)
    ch2 = jnp.where(far, 1.0, pair_feature[..., 2] / math.pi)
    ch3 = jnp.where(far, 1.0, 2.0 * pair_feature[..., 3] / math.pi - 1.0)
    return jnp.stack([ch0, ch1, ch2, ch3], axis=-1)                # (B, N, N, 4)


def generate_pair_from_affine(affine):
    pos = quat_affine_to_pos(affine.quaternion, affine.translation)
    return process_pair(get_map_ch(pos))


# ----------------------------------------------------------------------------
# Model pieces
# ----------------------------------------------------------------------------
def invariant_point_attention(params, inputs_1d, inputs_2d, affine, cfg, dist_epsilon=1e-8):
    B, N, _ = inputs_1d.shape
    H = cfg["num_head"]
    Csqk, Pqk = cfg["num_scalar_qk"], cfg["num_point_qk"]
    Csv, Pv = cfg["num_scalar_v"], cfg["num_point_v"]
    Cp = inputs_2d.shape[-1]

    scalar_variance = max(Csqk, 1) * 1.0
    point_variance = max(Pqk, 1) * 9.0 / 2
    num_logit_terms = 3
    scalar_weights = math.sqrt(1.0 / (num_logit_terms * scalar_variance))
    attention_2d_weights = math.sqrt(1.0 / num_logit_terms)
    point_w = math.sqrt(1.0 / (num_logit_terms * point_variance)) * \
        jax.nn.softplus(params["trainable_point_weights"])         # (H,)
    sqrt_pw = jnp.sqrt(point_w)                                    # (H,)

    # --- fused input projection (4 linears -> one matmul; scalar_weights folded into q slice) ---
    s_q = H * Csqk
    s_kv = H * (Csv + Csqk)
    s_qp = H * 3 * Pqk
    w_fused = jnp.concatenate([
        params["q_scalar"]["w"] * scalar_weights,
        params["kv_scalar"]["w"],
        params["q_point_local"]["w"],
        params["kv_point_local"]["w"]], axis=-1)
    b_fused = jnp.concatenate([
        params["q_scalar"]["b"] * scalar_weights,
        params["kv_scalar"]["b"],
        params["q_point_local"]["b"],
        params["kv_point_local"]["b"]], axis=-1)
    proj = linear_pallas(inputs_1d, w_fused, b_fused)              # (B, N, 120)

    q_scalar = proj[..., :s_q].reshape(B, N, H, Csqk)              # already * scalar_weights
    kv_scalar = proj[..., s_q:s_q + s_kv].reshape(B, N, H, Csv + Csqk)
    k_scalar = kv_scalar[..., :Csqk]
    v_scalar = kv_scalar[..., Csqk:]

    q_point_local = proj[..., s_q + s_kv:s_q + s_kv + s_qp]
    qdim = s_qp // 3
    qpl = [q_point_local[..., i * qdim:(i + 1) * qdim] for i in range(3)]
    q_point = [x.reshape(B, N, H, Pqk) for x in affine.apply_to_point(qpl, extra_dims=1)]

    kv_point_local = proj[..., s_q + s_kv + s_qp:]
    kdim = kv_point_local.shape[-1] // 3
    kpl = [kv_point_local[..., i * kdim:(i + 1) * kdim] for i in range(3)]
    kv_point_global = [x.reshape(B, N, H, Pqk + Pv)
                       for x in affine.apply_to_point(kpl, extra_dims=1)]
    k_point = [x[..., :Pqk] for x in kv_point_global]
    v_point = [x[..., Pqk:] for x in kv_point_global]

    hswap = lambda x: jnp.swapaxes(x, -2, -3)                      # (B,N,H,C)->(B,H,N,C)
    qs, ks = hswap(q_scalar), hswap(k_scalar)                      # (B,H,N,Csqk)
    vs = hswap(v_scalar)                                           # (B,H,N,Csv)
    qp = jnp.concatenate([hswap(x) for x in q_point], axis=-1)     # (B,H,N,3*Pqk)
    kp = jnp.concatenate([hswap(x) for x in k_point], axis=-1)
    vp = jnp.concatenate([hswap(x) for x in v_point], axis=-1)     # (B,H,N,3*Pv)

    # Fold point weights into the points (pw*||q-k||^2 == ||sqrt(pw)q - sqrt(pw)k||^2),
    # then build augmented Q/K so the kernel's logits need a single MXU matmul:
    #   qa . ka^T = qs.ks + qp.kp - 0.5||qp||^2 - 0.5||kp||^2 + aw*b2d[h]
    qp = qp * sqrt_pw[None, :, None, None]
    kp = kp * sqrt_pw[None, :, None, None]
    qn = jnp.sum(qp * qp, axis=-1, keepdims=True)                  # (B,H,N,1)
    kn = jnp.sum(kp * kp, axis=-1, keepdims=True)
    ones = jnp.ones_like(qn)
    b2d_col = jnp.broadcast_to(
        (attention_2d_weights * params["attention_2d"]["b"]).reshape(1, H, 1, 1),
        (B, H, N, 1))
    q_aug = jnp.concatenate([qs, qp, -0.5 * qn, -0.5 * ones, b2d_col], axis=-1)
    k_aug = jnp.concatenate([ks, kp, ones, kn, ones], axis=-1)

    w2d_scaled = attention_2d_weights * params["attention_2d"]["w"]   # (Cp, H)

    out = ipa_attention_pallas(q_aug, k_aug, vs, vp, w2d_scaled, inputs_2d)  # (B,H,N,Ctot)

    res_s = out[..., :Csv]
    res_p = out[..., Csv:Csv + 3 * Pv]
    res_2d = out[..., Csv + 3 * Pv:]

    result_scalar = jnp.swapaxes(res_s, -2, -3).reshape(B, N, H * Csv)
    rp = jnp.swapaxes(res_p, -2, -3)                               # (B,N,H,3*Pv)
    result_point_global = [rp[..., i * Pv:(i + 1) * Pv].reshape(B, N, H * Pv)
                           for i in range(3)]
    result_point_local = affine.invert_point(result_point_global, extra_dims=1)
    point_norm = jnp.sqrt(dist_epsilon
                          + jnp.square(result_point_local[0])
                          + jnp.square(result_point_local[1])
                          + jnp.square(result_point_local[2]))
    result_over_2d = jnp.swapaxes(res_2d, -2, -3).reshape(B, N, H * Cp)

    final_act = jnp.concatenate(
        [result_scalar] + result_point_local + [point_norm, result_over_2d], axis=-1)
    return linear_pallas(final_act, **params["output_projection"])


def fold_block(params, activations, cfg):
    affine = QuatAffine.from_tensor(activations["affine"])

    # pair features from current affine (reference passes the string 'pair' — bug; use affine)
    act_pair = generate_pair_from_affine(affine)                   # (B, N, N, 4) channel-last
    for blk in params["pair_transition"]:
        act_pair = resnet_block_noT(blk, act_pair)                 # (B, N, N, Cp)

    act = activations["act"]
    # TODO(synk): reference omits the `mask` argument in the IPA call; all-ones mask assumed.
    act_attn = invariant_point_attention(params["ipa"], act, act_pair, affine, cfg)

    # Fused: residual + LN + transition MLP (+residual) + LN + affine_update (dropout p=0).
    act, affine_update = post_attention_pallas(act, act_attn, params)

    affine = affine.pre_compose(affine_update)
    outputs = {"affine": affine.to_tensor()}
    # apply_rotation_tensor_fn(torch.detach) -> stop_gradient on rotation; identity in forward
    new_activations = {"act": act, "affine": affine.to_tensor()}
    return new_activations, outputs


def affine_generator(params, representations, cfg):
    act = ln_linear_pallas(representations["single"],
                           params["single_layer_norm"]["g"], params["single_layer_norm"]["b"],
                           params["initial_projection"]["w"], params["initial_projection"]["b"])
    affine = generate_quataffine(representations["affine"])
    activations = {"act": act, "affine": affine.to_tensor()}
    outputs = []
    for l_id in range(cfg["num_layer"]):
        activations, output = fold_block(params["fold_iterations"][l_id], activations, cfg)
        outputs.append(output)
    return {"affine": jnp.stack([o["affine"] for o in outputs], axis=0),
            "act": activations["act"]}


def structure_module(params, representations, batch, cfg):
    output = affine_generator(params["affine_generator"], representations, cfg)
    ret = {"representations": {"structure_module": output["act"]}}
    scale = jnp.array([1.0] * 4 + [cfg["position_scale"]] * 3, jnp.float32)
    ret["traj"] = output["affine"] * scale
    # reference indexes traj[:, :4]/[:, 4:] (layer axis) — interpreted as last-axis split
    ret["atom_pos"] = quat_affine_to_pos(ret["traj"][..., :4], ret["traj"][..., 4:])
    # cfg['gen_seq'] is False -> no sequence generator
    return ret


# ----------------------------------------------------------------------------
# Deterministic parameter initialization (synthetic; no checkpoint load)
# ----------------------------------------------------------------------------
def init_linear(key, din, dout):
    kw, kb = jax.random.split(key)
    return {"w": (1.0 / math.sqrt(din)) * jax.random.normal(kw, (din, dout), jnp.float32),
            "b": 0.01 * jax.random.normal(kb, (dout,), jnp.float32)}


def init_conv(key, cin, cout, k):
    kw, kb = jax.random.split(key)
    scale = 1.0 / math.sqrt(cin * k * k)
    return (scale * jax.random.normal(kw, (cout, cin, k, k), jnp.float32),
            0.01 * jax.random.normal(kb, (cout,), jnp.float32))


def init_ipa(key, cfg, msa_channel, pair_channel):
    H, Csqk, Pqk = cfg["num_head"], cfg["num_scalar_qk"], cfg["num_point_qk"]
    Csv, Pv = cfg["num_scalar_v"], cfg["num_point_v"]
    keys = jax.random.split(key, 6)
    num_final_input = H * Csv + H * Pv * 4 + H * pair_channel
    return {
        "q_scalar": init_linear(keys[0], msa_channel, H * Csqk),
        "kv_scalar": init_linear(keys[1], msa_channel, H * (Csv + Csqk)),
        "q_point_local": init_linear(keys[2], msa_channel, H * 3 * Pqk),
        "kv_point_local": init_linear(keys[3], msa_channel, H * 3 * (Pqk + Pv)),
        "trainable_point_weights": jnp.full((H,), 0.541323855, jnp.float32),
        "attention_2d": init_linear(keys[4], pair_channel, H),
        "output_projection": init_linear(keys[5], num_final_input, cfg["num_channel"]),
    }


def init_fold_block(key, cfg, msa_channel, pair_channel):
    keys = jax.random.split(key, 8)
    pc = cfg["pair_channels"]
    pair_blocks = []
    for idx in range(len(pc) - 1):
        k1, k2, k3 = jax.random.split(keys[5 + idx], 3)
        w1, b1 = init_conv(k1, pc[idx], pc[idx + 1], 3)
        w2, b2 = init_conv(k2, pc[idx + 1], pc[idx + 1], 3)
        ws, bs = init_conv(k3, pc[idx], pc[idx + 1], 1)
        pair_blocks.append({"conv1_w": w1, "conv1_b": b1, "conv2_w": w2, "conv2_b": b2,
                            "skip_w": ws, "skip_b": bs})
    return {
        "ipa": init_ipa(keys[0], cfg, msa_channel, pair_channel),
        "attention_layer_norm": {"g": jnp.ones(msa_channel), "b": jnp.zeros(msa_channel)},
        "transition": [init_linear(keys[1], msa_channel, cfg["num_channel"]),
                       init_linear(keys[2], cfg["num_channel"], cfg["num_channel"])],
        "transition_layer_norm": {"g": jnp.ones(cfg["num_channel"]),
                                  "b": jnp.zeros(cfg["num_channel"])},
        "affine_update": init_linear(keys[3], cfg["num_channel"], 6),
        "pair_transition": pair_blocks,
    }


def init_params(key, cfg, msa_channel, pair_channel):
    keys = jax.random.split(key, cfg["num_layer"] + 2)
    return {"affine_generator": {
        "single_layer_norm": {"g": jnp.ones(msa_channel), "b": jnp.zeros(msa_channel)},
        "initial_projection": init_linear(keys[0], msa_channel, cfg["num_channel"]),
        "fold_iterations": [init_fold_block(keys[2 + l], cfg, cfg["num_channel"], pair_channel)
                            for l in range(cfg["num_layer"])],
    }}


# ----------------------------------------------------------------------------
if __name__ == "__main__":
    key = jax.random.PRNGKey(0)
    B, N = 2, 8
    k1, k2, k3, kp = jax.random.split(key, 4)

    single = jax.random.normal(k1, (B, N, MSA_CHANNEL), jnp.float32)
    quat = jnp.concatenate([jnp.ones((B, N, 1), jnp.float32),
                            0.1 * jax.random.normal(k2, (B, N, 3), jnp.float32)], axis=-1)
    trans = 5.0 * jax.random.normal(k3, (B, N, 3), jnp.float32)
    representations = {"single": single, "affine": jnp.concatenate([quat, trans], axis=-1)}
    batch = {}  # unused in the reference forward

    params = init_params(kp, CONFIG, MSA_CHANNEL, PAIR_CHANNEL)
    ret = structure_module(params, representations, batch, CONFIG)
    jax.tree_util.tree_map(jax.block_until_ready, ret)

    assert ret["representations"]["structure_module"].shape == (B, N, CONFIG["num_channel"])
    assert ret["traj"].shape == (CONFIG["num_layer"], B, N, 7)
    assert ret["atom_pos"].shape == (CONFIG["num_layer"], B, N, 3, 3)
    print("KERNEL_OK")
</pallas_src>

<mosaic_0001>
module attributes {stable_mosaic.version = 11 : i64} {
  func.func @_ln_linear_kernel(%arg0: i32, %arg1: memref<16x32xf32, #tpu.memory_space<vmem>>, %arg2: memref<1x32xf32, #tpu.memory_space<vmem>>, %arg3: memref<1x32xf32, #tpu.memory_space<vmem>>, %arg4: memref<32x32xf32, #tpu.memory_space<vmem>>, %arg5: memref<1x32xf32, #tpu.memory_space<vmem>>, %arg6: memref<16x32xf32, #tpu.memory_space<vmem>>) attributes {dimension_semantics = [#tpu.dimension_semantics<parallel>], iteration_bounds = array<i64: 1>, scalar_prefetch = 0 : i64, scratch_operands = 0 : i64, tpu.core_type = #tpu.core_type<tc>, window_params = [{transform_indices = @transform_0, window_bounds = array<i64: 16, 32>}, {pipeline_mode = #tpu.pipeline_mode<synchronous>, transform_indices = @transform_1, window_bounds = array<i64: 1, 32>}, {pipeline_mode = #tpu.pipeline_mode<synchronous>, transform_indices = @transform_2, window_bounds = array<i64: 1, 32>}, {pipeline_mode = #tpu.pipeline_mode<synchronous>, transform_indices = @transform_3, window_bounds = array<i64: 32, 32>}, {pipeline_mode = #tpu.pipeline_mode<synchronous>, transform_indices = @transform_4, window_bounds = array<i64: 1, 32>}, {transform_indices = @transform_5, window_bounds = array<i64: 16, 32>}]} {
    %c0 = arith.constant 0 : index
    %c0_0 = arith.constant 0 : index
    %0 = vector.load %arg1[%c0, %c0_0] : memref<16x32xf32, #tpu.memory_space<vmem>>, vector<16x32xf32>
    %cst = arith.constant dense<0.000000e+00> : vector<16xf32>
    %1 = vector.multi_reduction <add>, %0, %cst [1] : vector<16x32xf32> to vector<16xf32>
    %2 = vector.shape_cast %1 : vector<16xf32> to vector<16x1xf32>
    %cst_1 = arith.constant 3.200000e+01 : f32
    %3 = vector.broadcast %cst_1 : f32 to vector<16x1xf32>
    %4 = arith.divf %2, %3 : vector<16x1xf32>
    %5 = vector.broadcast %4 : vector<16x1xf32> to vector<16x32xf32>
    %6 = arith.subf %0, %5 : vector<16x32xf32>
    %7 = arith.mulf %6, %6 : vector<16x32xf32>
    %cst_2 = arith.constant dense<0.000000e+00> : vector<16xf32>
    %8 = vector.multi_reduction <add>, %7, %cst_2 [1] : vector<16x32xf32> to vector<16xf32>
    %9 = vector.shape_cast %8 : vector<16xf32> to vector<16x1xf32>
    %cst_3 = arith.constant 3.200000e+01 : f32
    %10 = vector.broadcast %cst_3 : f32 to vector<16x1xf32>
    %11 = arith.divf %9, %10 : vector<16x1xf32>
    %12 = vector.broadcast %4 : vector<16x1xf32> to vector<16x32xf32>
    %13 = arith.subf %0, %12 : vector<16x32xf32>
    %cst_4 = arith.constant 9.99999974E-6 : f32
    %14 = vector.broadcast %cst_4 : f32 to vector<16x1xf32>
    %15 = arith.addf %11, %14 : vector<16x1xf32>
    %16 = math.rsqrt %15 : vector<16x1xf32>
    %17 = vector.broadcast %16 : vector<16x1xf32> to vector<16x32xf32>
    %18 = arith.mulf %13, %17 : vector<16x32xf32>
    %c0_5 = arith.constant 0 : index
    %c0_6 = arith.constant 0 : index
    %19 = vector.load %arg2[%c0_5, %c0_6] : memref<1x32xf32, #tpu.memory_space<vmem>>, vector<1x32xf32>
    %20 = vector.broadcast %19 : vector<1x32xf32> to vector<16x32xf32>
    %21 = arith.mulf %18, %20 : vector<16x32xf32>
    %c0_7 = arith.constant 0 : index
    %c0_8 = arith.constant 0 : index
    %22 = vector.load %arg3[%c0_7, %c0_8] : memref<1x32xf32, #tpu.memory_space<vmem>>, vector<1x32xf32>
    %23 = vector.broadcast %22 : vector<1x32xf32> to vector<16x32xf32>
    %24 = arith.addf %21, %23 : vector<16x32xf32>
    %c0_9 = arith.constant 0 : index
    %c0_10 = arith.constant 0 : index
    %25 = vector.load %arg4[%c0_9, %c0_10] : memref<32x32xf32, #tpu.memory_space<vmem>>, vector<32x32xf32>
    %cst_11 = arith.constant dense<0.000000e+00> : vector<16x32xf32>
    %26 = tpu.matmul %24, %25, %cst_11 {dimension_numbers = #tpu.dot_dimension_numbers<[1], [0], [0], [1], [0, 0, 1, 1], [], []>} : vector<16x32xf32>, vector<32x32xf32>, vector<16x32xf32> -> vector<16x32xf32>
    %c0_12 = arith.constant 0 : index
    %c0_13 = arith.constant 0 : index
    %27 = vector.load %arg5[%c0_12, %c0_13] : memref<1x32xf32, #tpu.memory_space<vmem>>, vector<1x32xf32>
    %28 = vector.broadcast %27 : vector<1x32xf32> to vector<16x32xf32>
    %29 = arith.addf %26, %28 : vector<16x32xf32>
    %c0_14 = arith.constant 0 : index
    %c0_15 = arith.constant 0 : index
    %30 = vector.load %arg6[%c0_14, %c0_15] : memref<16x32xf32, #tpu.memory_space<vmem>>, vector<16x32xf32>
    tpu.vector_store %arg6[%c0_14, %c0_15], %29 {strides = array<i32>} : memref<16x32xf32, #tpu.memory_space<vmem>>, vector<16x32xf32>,
    return
  }
  func.func @transform_0(%arg0: i32) -> (i32, i32) {
    %c0_i32 = arith.constant 0 : i32
    %c0_i32_0 = arith.constant 0 : i32
    return %arg0, %c0_i32 : i32, i32
  }
  func.func @transform_1(%arg0: i32) -> (i32, i32) {
    %c0_i32 = arith.constant 0 : i32
    %c0_i32_0 = arith.constant 0 : i32
    %c0_i32_1 = arith.constant 0 : i32
    return %c0_i32, %c0_i32_0 : i32, i32
  }
  func.func @transform_2(%arg0: i32) -> (i32, i32) {
    %c0_i32 = arith.constant 0 : i32
    %c0_i32_0 = arith.constant 0 : i32
    %c0_i32_1 = arith.constant 0 : i32
    return %c0_i32, %c0_i32_0 : i32, i32
  }
  func.func @transform_3(%arg0: i32) -> (i32, i32) {
    %c0_i32 = arith.constant 0 : i32
    %c0_i32_0 = arith.constant 0 : i32
    %c0_i32_1 = arith.constant 0 : i32
    return %c0_i32, %c0_i32_0 : i32, i32
  }
  func.func @transform_4(%arg0: i32) -> (i32, i32) {
    %c0_i32 = arith.constant 0 : i32
    %c0_i32_0 = arith.constant 0 : i32
    %c0_i32_1 = arith.constant 0 : i32
    return %c0_i32, %c0_i32_0 : i32, i32
  }
  func.func @transform_5(%arg0: i32) -> (i32, i32) {
    %c0_i32 = arith.constant 0 : i32
    %c0_i32_0 = arith.constant 0 : i32
    return %arg0, %c0_i32 : i32, i32
  }
}

</mosaic_0001>

<bundles_post_ra>
// kernel: tpu_custom_call.1
= control target key start
LH: loop header
LB: loop body
LE: loop exit
PB: predicated region body
PF: predicated region fallthrough
CT: control target
= control target key end

     0   :  { %10 = vsyncpa [#allocation3], 0  ;;  %s387_s0 = inlined_call_operand.hbm [shape: f32[16,32], index: 0, kind: input, shape index: {}]   ;;  %s388_s1 = inlined_call_operand.hbm [shape: f32[1,32], index: 1, kind: input, shape index: {}]   ;;  %s389_s2 = inlined_call_operand.vmem [shape: f32[1,32], index: 2, kind: input, shape index: {}]   ;;  %s390_s3 = inlined_call_operand.hbm [shape: f32[32,32], index: 3, kind: input, shape index: {}]   ;;  %s391_s4 = inlined_call_operand.vmem [shape: f32[1,32], index: 4, kind: input, shape index: {}]   ;;  %s392_s5 = inlined_call_operand.hbm [shape: f32[16,32], index: 5, kind: output, shape index: {}]  }
   0x1   :  { %11 = vsyncpa [#allocation6], 0  ;;  %s31_s20 = sshll.u32 %s388_s1, 4  ;;  %s32_s20 = int_to_ptr.hbm [resolvable:$true] %s31_s20 }
   0x2   :  { %12 = vsyncpa [#allocation4], 0  ;;  %s315_s21 = smov [#allocation5]   ;;  %s17_s25 = sshll.u32 %s387_s0, 4  ;;  %s18_s25 = int_to_ptr.hbm [resolvable:$true] %s17_s25 }
   0x3   :  { %s33_s22 = sshll.u32 %s315_s21, 4  ;;  %s316_s26 = smov [#allocation2]   ;;  %s34_s22 = int_to_ptr.vmem [resolvable:$true] %s33_s22 }
   0x4   :  { %36 = dma.hbm_to_vmem [thread:$0]  %s32_s20, 16, %s34_s22, [#allocation6]  }
   0x5   :  { %s19_s27 = sshll.u32 %s316_s26, 4  ;;  %s317_s28 = smov 128   ;;  %s20_s27 = int_to_ptr.vmem [resolvable:$true] %s19_s27 }
   0x6   :  { %s318_s29 = smov 8   ;;  %s43_s6 = sshll.u32 %s390_s3, 4  ;;  %s44_s6 = int_to_ptr.hbm [resolvable:$true] %s43_s6 }
   0x7   :  { %25 = dma.hbm_to_vmem [thread:$0]  %s18_s25, 256, %s20_s27, [#allocation3], %s317_s28, %s317_s28, %s318_s29  }
   0x8   :  { %s319_s7 = smov [#allocation7]  }
   0x9   :  { %s45_s8 = sshll.u32 %s319_s7, 4  ;;  %s46_s8 = int_to_ptr.vmem [resolvable:$true] %s45_s8 }
   0xa   :  { %51 = dma.hbm_to_vmem [thread:$0]  %s44_s6, 512, %s46_s8, [#allocation6], %s317_s28, %s317_s28, %s318_s29  }
   0xb   :  { %309 = dma.done.wait [#allocation3], 256  }
   0xc   :  { %310 = vsyncadd [#allocation3], 4294967040 }
   0xd   :  { %311 = dma.done.wait [#allocation6], 528  }
   0xe   :  { %312 = vsyncadd [#allocation6], 4294966768  ;;  %vm68_vm0 = vcmask 261120   ;;  %v66_v0 = vld [vmem:[#allocation2] sm:$0xff]  ;;  %v67_v2 = vld [vmem:[#allocation2 + $0x8] sm:$0xff]  ;;  %v320_v4 = vmov 32.0  }
   0xf   :  { %v69_v1 = vsel %vm68_vm0, %v66_v0, 0.0  ;;  %v72_v3 = vsel %vm68_vm0, %v67_v2, 0.0  ;;  %207 = vrcp.f32 %v320_v4  ;;  %v135_v21 = vld [vmem:[#allocation7 + $0x18] sm:$0xff]  ;;  %v134_v22 = vld [vmem:[#allocation7 + $0x10] sm:$0xff]  ;;  %v133_v23 = vld [vmem:[#allocation7 + $0x8] sm:$0xff]  ;;  %s177_s14 = sshll.u32 %s392_s5, 4  ;;  %s178_s14 = int_to_ptr.hbm [resolvable:$true] %s177_s14 }
  0x10   :  { %70 = vadd.xlane.f32.xlu0 %v69_v1  ;;  %158 = vmatpush.msra.mxu0 %v135_v21  ;;  %v132_v24 = vld [vmem:[#allocation7] sm:$0xff]  ;;  %v204_v39 = vld [vmem:[#allocation5] ss:$0 sm:$0xff]  ;;  %v205_v43 = vld [vmem:[%s389_s2] ss:$0 sm:$0xff]  ;;  %s321_s2 = smov [#allocation8]  }
  0x11   :  { %193 = vmatpush.msra.mxu1 %v135_v21  ;;  %v206_v53 = vld [vmem:[%s391_s4] ss:$0 sm:$0xff]  ;;  %s175_s11 = sshll.u32 %s321_s2, 4  ;;  %s176_s11 = int_to_ptr.vmem [resolvable:$true] %s175_s11 }
  0x12   :  { %159 = vmatpush.msra.mxu0 %v134_v22 }
  0x13   :  { %194 = vmatpush.msra.mxu1 %v134_v22 }
  0x14   :  { %160 = vmatpush.msra.mxu0 %v133_v23 }
  0x15   :  { %v208_v5 = vpop.eup %207  ;;  %195 = vmatpush.msra.mxu1 %v133_v23 }
  0x16   :  { %v76_v6 = vmul.f32 32.0, %v208_v5  ;;  %vm80_vm1 = vweird.f32 %v208_v5  ;;  %161 = vmatpush.msra.mxu0 %v132_v24 }
  0x17   :  { %196 = vmatpush.msra.mxu1 %v132_v24 }
  0x18   :  { %73 = vadd.xlane.f32.xlu0 %v72_v3  ;;  %v77_v7 = vsub.f32 1.0, %v76_v6 }
  0x1a   :  { %v78_v8 = vmul.f32 %v208_v5, %v77_v7 }
  0x1c   :  { %v79_v9 = vadd.f32 %v208_v5, %v78_v8 }
  0x1e   :  { %v81_v10 = vsel %vm80_vm1, %v208_v5, %v79_v9 }
  0x83   :  { %v71_v11 = vpop.xlane.xlu0 %70 }
  0x84   :  { %v82_v12 = vmul.f32 %v81_v10, %v71_v11 }
  0x86   :  { %v84_v13 = vsub.f32 %v66_v0, %v82_v12 }
  0x88   :  { %v86_v14 = vmul.f32 %v84_v13, %v84_v13 }
  0x8a   :  { %v88_v15 = vsel %vm68_vm0, %v86_v14, 0.0 }
  0x8b   :  { %89 = vadd.xlane.f32.xlu1 %v88_v15  ;;  %v74_v16 = vpop.xlane.xlu0 %73 }
  0x8c   :  { %v83_v17 = vmul.f32 %v81_v10, %v74_v16 }
  0x8e   :  { %v85_v18 = vsub.f32 %v67_v2, %v83_v17 }
  0x90   :  { %v87_v19 = vmul.f32 %v85_v18, %v85_v18 }
  0x92   :  { %v91_v20 = vsel %vm68_vm0, %v87_v19, 0.0 }
  0x93   :  { %92 = vadd.xlane.f32.xlu1 %v91_v20 }
  0xfe   :  { %v90_v25 = vpop.xlane.xlu1 %89 }
  0xff   :  { %v94_v26 = vmul.f32 %v90_v25, %v81_v10 }
 0x101   :  { %v96_v27 = vadd.f32 1e-05, %v94_v26 }
 0x103   :  { %209 = vrsqrt.f32 %v96_v27  ;;  %vm104_vm3 = vweird.f32 %v96_v27 }
 0x106   :  { %v93_v28 = vpop.xlane.xlu1 %92 }
 0x107   :  { %v95_v29 = vmul.f32 %v93_v28, %v81_v10 }
 0x109   :  { %v210_v30 = vpop.eup %209  ;;  %v97_v31 = vadd.f32 1e-05, %v95_v29 }
 0x10a   :  { %v99_v32 = vmul.f32 %v210_v30, %v96_v27  ;;  %vm105_vm2 = vweird.f32 %v210_v30 }
 0x10b   :  { %211 = vrsqrt.f32 %v97_v31  ;;  %vm106_vm4 = vmor %vm104_vm3, %vm105_vm2  ;;  %vm114_vm6 = vweird.f32 %v97_v31 }
 0x10c   :  { %v100_v33 = vmul.f32 %v210_v30, %v99_v32 }
 0x10e   :  { %v101_v34 = vmul.f32 0.5, %v100_v33 }
 0x110   :  { %v102_v35 = vsub.f32 1.5, %v101_v34 }
 0x111   :  { %v212_v36 = vpop.eup %211 }
 0x112   :  { %v103_v37 = vmul.f32 %v210_v30, %v102_v35  ;;  %v109_v38 = vmul.f32 %v212_v36, %v97_v31  ;;  %vm115_vm5 = vweird.f32 %v212_v36 }
 0x113   :  { %vm116_vm7 = vmor %vm114_vm6, %vm115_vm5 }
 0x114   :  { %v107_v40 = vsel %vm106_vm4, %v210_v30, %v103_v37  ;;  %v110_v41 = vmul.f32 %v212_v36, %v109_v38 }
 0x115   :  { %v118_v42 = vmul.f32 %v107_v40, %v84_v13 }
 0x116   :  { %v111_v44 = vmul.f32 0.5, %v110_v41 }
 0x117   :  { %v124_v45 = vmul.f32 %v204_v39, %v118_v42 }
 0x118   :  { %v112_v46 = vsub.f32 1.5, %v111_v44 }
 0x119   :  { %v130_v47 = vadd.f32 %v205_v43, %v124_v45 }
 0x11a   :  { %v113_v48 = vmul.f32 %v212_v36, %v112_v46 }
 0x11b   :  { %191 = vmatmul.msk.f32.vlgmr.msra.gmra.mxu0 %vm68_vm0, %v130_v47 }
 0x11c   :  { %v117_v49 = vsel %vm116_vm7, %v212_v36, %v113_v48 }
 0x11d   :  { %v119_v50 = vmul.f32 %v117_v49, %v85_v18 }
 0x11f   :  { %v125_v51 = vmul.f32 %v204_v39, %v119_v50 }
 0x121   :  { %v131_v52 = vadd.f32 %v205_v43, %v125_v51 }
 0x123   :  { %192 = vmatmul.msk.f32.vlgmr.msra.gmra.mxu1 %vm68_vm0, %v131_v52 }
 0x198   :  { %v163_v54 = vpop.f32.mrf.mxu0 }
 0x199   :  { %v164_v55 = vadd.f32 %v206_v53, %v163_v54 }
 0x19b   :  { %169 = vst.msk [vmem:[#allocation8] sm:$0xff] %vm68_vm0, %v164_v55 }
 0x1a0   :  { %v166_v56 = vpop.f32.mrf.mxu1 }
 0x1a1   :  { %v167_v57 = vadd.f32 %v206_v53, %v166_v56 }
 0x1a3   :  { %170 = vst.msk [vmem:[#allocation8 + $0x8] sm:$0xff] %vm68_vm0, %v167_v57 }
 0x1a4   :  { %183 = dma.vmem_to_hbm [thread:$0]  %s176_s11, 256, %s178_s14, [#allocation4], %s317_s28, %s317_s28, %s318_s29  }
 0x1a5   :  { %313 = dma.done.wait [#allocation4], 256  }
 0x1a6   :  { %314 = vsyncadd [#allocation4], 4294967040 }
 0x1a7   :  { %188 = vsyncpa [#allocation3], 1 }
 0x1a8   :  { %189 = vsyncpa [#allocation6], 1 }
 0x1a9   :  { %190 = vsyncpa [#allocation4], 1 }

</bundles_post_ra>
